<compile_context>
chip_gen: v7x
topology: tpu7x:2x2x1
jax: 0.10.0
libtpu: 0.0.40
codegen_flags: <defaults>
</compile_context>

<pallas_src>
import functools

import jax
import jax.numpy as jnp
from jax.experimental import pallas as pl
from jax.experimental.pallas import tpu as pltpu


def _round_up(x, m):
    return ((x + m - 1) // m) * m


def _pick_tile(m, target=256):
    """Largest power-of-two tile <= target that divides m (m is a mult. of 8)."""
    for t in (512, 256, 128, 64, 32, 16, 8):
        if t <= target and m % t == 0:
            return t
    return m


# ----------------------------- Pallas kernels ------------------------------

def _conv_stats_kernel(a_ref, b_ref, o_ref, stats_ref):
    """One M-tile of the im2col matmul plus per-channel sum / sum-of-squares.

    a_ref:     (tm, K)   im2col activations (bf16 or f32)
    b_ref:     (K,  Cp)  weights; Cp is a multiple of 128 -> lane-dense output
    o_ref:     (tm, Cp)  f32 raw conv output tile (unmasked full-lane stores)
    stats_ref: (8,  Cp)  row 0 = per-channel sum of this tile,
                         row 1 = per-channel sum of squares, rows 2..7 = 0.
    """
    acc = jnp.dot(a_ref[...], b_ref[...], preferred_element_type=jnp.float32)
    o_ref[...] = acc
    csum = jnp.sum(acc, axis=0, keepdims=True)
    csq = jnp.sum(acc * acc, axis=0, keepdims=True)
    row = jax.lax.broadcasted_iota(jnp.int32, stats_ref.shape, 0)
    stats_ref[...] = jnp.where(row == 0, csum, jnp.where(row == 1, csq, 0.0))


def pallas_conv_matmul_stats(a, b, compute_dtype=jnp.bfloat16, tm=256):
    """a: (M, K), b: (K, Cp) with Cp a multiple of 128.

    Returns:
      y        (Mp, Cp) f32 raw conv output (rows >= M are zero, harmless)
      ch_sum   (Cp,)    per-channel sum over the M valid rows
      ch_sqsum (Cp,)    per-channel sum of squares over the M valid rows
    """
    M, K = a.shape
    _, Cp = b.shape
    tm = min(tm, _round_up(M, 8))          # keep tm a multiple of 8
    Mp = _round_up(M, tm)
    if Mp != M:
        # Zero rows contribute nothing to sum/sumsq, so stats stay exact.
        a = jnp.pad(a, ((0, Mp - M), (0, 0)))
    a = a.astype(compute_dtype)
    b = b.astype(compute_dtype)
    num_tiles = Mp // tm

    y, stats = pl.pallas_call(
        _conv_stats_kernel,
        out_shape=(jax.ShapeDtypeStruct((Mp, Cp), jnp.float32),
                   jax.ShapeDtypeStruct((num_tiles * 8, Cp), jnp.float32)),
        grid=(num_tiles,),
        in_specs=[pl.BlockSpec((tm, K), lambda i: (i, 0)),
                  pl.BlockSpec((K, Cp), lambda i: (0, 0))],
        out_specs=(pl.BlockSpec((tm, Cp), lambda i: (i, 0)),
                   pl.BlockSpec((8, Cp), lambda i: (i, 0))),
        compiler_params=pltpu.CompilerParams(
            dimension_semantics=("parallel",)),
    )(a, b)

    stats = stats.reshape(num_tiles, 8, Cp)
    ch_sum = jnp.sum(stats[:, 0, :], axis=0)
    ch_sqsum = jnp.sum(stats[:, 1, :], axis=0)
    return y, ch_sum, ch_sqsum


def _bn_act_kernel(x_ref, scale_ref, bias_ref, *rest,
                   apply_relu, has_residual, residual_has_bn):
    """Fused folded-BN (+ residual, whose own folded BN is applied here) + ReLU."""
    o_ref = rest[-1]
    y = x_ref[...].astype(jnp.float32) * scale_ref[...] + bias_ref[...]
    if has_residual:
        r = rest[0][...].astype(jnp.float32)
        if residual_has_bn:
            r = r * rest[1][...] + rest[2][...]
        y = y + r
    if apply_relu:
        y = jnp.maximum(y, 0.0)
    o_ref[...] = y.astype(o_ref.dtype)


def pallas_bn_act(x, scale, bias, residual=None, res_scale=None, res_bias=None,
                  apply_relu=True, out_dtype=jnp.float32, tm=256):
    """x, residual: (M, C); scale/bias vectors: (C,).  M mult of 8, C of 128."""
    M, C = x.shape
    tm = _pick_tile(M, tm)
    has_res = residual is not None
    res_bn = res_scale is not None
    kernel = functools.partial(_bn_act_kernel, apply_relu=apply_relu,
                               has_residual=has_res, residual_has_bn=res_bn)

    row_spec = pl.BlockSpec((tm, C), lambda i: (i, 0))
    vec_spec = pl.BlockSpec((1, C), lambda i: (0, 0))
    in_specs = [row_spec, vec_spec, vec_spec]
    args = [x, scale.reshape(1, C), bias.reshape(1, C)]
    if has_res:
        in_specs.append(row_spec)
        args.append(residual)
        if res_bn:
            in_specs += [vec_spec, vec_spec]
            args += [res_scale.reshape(1, C), res_bias.reshape(1, C)]

    return pl.pallas_call(
        kernel,
        out_shape=jax.ShapeDtypeStruct((M, C), out_dtype),
        grid=(M // tm,),
        in_specs=in_specs,
        out_specs=row_spec,
        compiler_params=pltpu.CompilerParams(
            dimension_semantics=("parallel",)),
    )(*args)


# ------------------------------- JAX glue ----------------------------------

def im2col(x_nhwc, kh, kw, stride, padding):
    """Extract conv patches; column order (Cin, kh, kw) matches PyTorch OIHW."""
    N, H, W, C = x_nhwc.shape
    Ho = (H + 2 * padding - kh) // stride + 1
    Wo = (W + 2 * padding - kw) // stride + 1
    xp = jnp.pad(x_nhwc, ((0, 0), (padding, padding), (padding, padding), (0, 0)))
    cols = []
    for ky in range(kh):
        for kx in range(kw):
            cols.append(xp[:, ky:ky + stride * Ho:stride, kx:kx + stride * Wo:stride, :])
    p = jnp.stack(cols, axis=0).reshape(kh, kw, N, Ho, Wo, C)
    p = jnp.transpose(p, (2, 3, 4, 5, 0, 1))          # (N, Ho, Wo, C, kh, kw)
    return p.reshape(N * Ho * Wo, C * kh * kw), (N, Ho, Wo)


def conv_bn_fold(x_nhwc, w, gamma, beta, stride, padding,
                 compute_dtype=jnp.bfloat16, eps=1e-5):
    """Conv (Pallas MXU matmul + in-kernel stats) and training-mode BN folded
    into per-channel (scale, bias) over lane-padded channels."""
    Cout, Cin, kh, kw = w.shape
    cols, (N, Ho, Wo) = im2col(x_nhwc, kh, kw, stride, padding)
    M = N * Ho * Wo
    Cp = _round_up(Cout, 128)                         # lane-dense output width
    w_mat = jnp.pad(w.reshape(Cout, Cin * kh * kw).T.astype(jnp.float32),
                    ((0, 0), (0, Cp - Cout)))
    y, ch_sum, ch_sqsum = pallas_conv_matmul_stats(cols, w_mat, compute_dtype)
    mean = ch_sum / M                                 # true M, not padded Mp
    var = jnp.maximum(ch_sqsum / M - jnp.square(mean), 0.0)   # guard cancellation
    g = jnp.pad(gamma.astype(jnp.float32), (0, Cp - Cout))
    b = jnp.pad(beta.astype(jnp.float32), (0, Cp - Cout))
    scale = g * jax.lax.rsqrt(var + eps)
    bias = b - mean * scale
    return y, scale, bias, (N, Ho, Wo, Cout, M)


def basic_block_forward(x_nchw, params, stride, compute_dtype=jnp.bfloat16):
    x = jnp.transpose(x_nchw, (0, 2, 3, 1)).astype(jnp.float32)   # NHWC
    in_ch = x.shape[-1]

    # conv1 -> bn1 -> relu   (no residual argument: no zero array streamed)
    y1, s1, b1, (N, Ho, Wo, C1, M1) = conv_bn_fold(
        x, params["w1"], params["g1"], params["b1"], stride, 1, compute_dtype)
    out1 = pallas_bn_act(y1, s1, b1, apply_relu=True, out_dtype=compute_dtype)
    out1_img = out1[:M1, :C1].reshape(N, Ho, Wo, C1)

    # conv2 -> bn2 (scale/bias applied inside the final fused kernel)
    y2, s2, b2, (_, _, _, C2, M2) = conv_bn_fold(
        out1_img, params["w2"], params["g2"], params["b2"], 1, 1, compute_dtype)
    Mp2, Cp2 = y2.shape

    if stride == 2:
        # conv shortcut: its folded BN is applied inside the same fused kernel,
        # so the shortcut tensor makes no standalone HBM round trip.
        ys, ss, bs, _ = conv_bn_fold(
            x, params["ws"], params["gs"], params["bs"], stride, 0, compute_dtype)
        out = pallas_bn_act(y2, s2, b2, residual=ys, res_scale=ss, res_bias=bs,
                            apply_relu=True)
    else:
        assert in_ch == C2, "identity shortcut requires in_ch == out_ch"
        sc = x.reshape(-1, in_ch)
        sc = jnp.pad(sc, ((0, Mp2 - sc.shape[0]), (0, Cp2 - in_ch)))
        out = pallas_bn_act(y2, s2, b2, residual=sc, apply_relu=True)

    out_img = out[:M2, :C2].reshape(N, Ho, Wo, C2)
    return jnp.transpose(out_img, (0, 3, 1, 2))       # back to NCHW


# --------------------------- pure-JAX reference -----------------------------

def _ref_conv(x, w, stride, padding):
    return jax.lax.conv_general_dilated(
        x, w, (stride, stride), [(padding, padding)] * 2,
        dimension_numbers=("NCHW", "OIHW", "NCHW"))


def _ref_bn(y, gamma, beta, eps=1e-5):
    mean = jnp.mean(y, axis=(0, 2, 3), keepdims=True)
    var = jnp.mean(jnp.square(y - mean), axis=(0, 2, 3), keepdims=True)
    g = gamma.reshape(1, -1, 1, 1)
    b = beta.reshape(1, -1, 1, 1)
    return g * (y - mean) / jnp.sqrt(var + eps) + b


def ref_basic_block(x, p, stride):
    out = jax.nn.relu(_ref_bn(_ref_conv(x, p["w1"], stride, 1), p["g1"], p["b1"]))
    out = _ref_bn(_ref_conv(out, p["w2"], 1, 1), p["g2"], p["b2"])
    if stride == 2:
        sc = _ref_bn(_ref_conv(x, p["ws"], stride, 0), p["gs"], p["bs"])
    else:
        sc = x
    return jax.nn.relu(out + sc)


# --------------------------------- main -------------------------------------

def _make_params(key, in_ch, out_ch, stride):
    ks = jax.random.split(key, 9)
    p = {
        "w1": 0.1 * jax.random.normal(ks[0], (out_ch, in_ch, 3, 3), jnp.float32),
        "g1": 1.0 + 0.1 * jax.random.normal(ks[1], (out_ch,), jnp.float32),
        "b1": 0.1 * jax.random.normal(ks[2], (out_ch,), jnp.float32),
        "w2": 0.1 * jax.random.normal(ks[3], (out_ch, out_ch, 3, 3), jnp.float32),
        "g2": 1.0 + 0.1 * jax.random.normal(ks[4], (out_ch,), jnp.float32),
        "b2": 0.1 * jax.random.normal(ks[5], (out_ch,), jnp.float32),
    }
    if stride == 2:
        p["ws"] = 0.1 * jax.random.normal(ks[6], (out_ch, in_ch, 1, 1), jnp.float32)
        p["gs"] = 1.0 + 0.1 * jax.random.normal(ks[7], (out_ch,), jnp.float32)
        p["bs"] = 0.1 * jax.random.normal(ks[8], (out_ch,), jnp.float32)
    return p


if __name__ == "__main__":
    key = jax.random.PRNGKey(0)
    k_a, k_b = jax.random.split(key)

    # (key, N, in_ch, out_ch, H, W, stride, compute_dtype, tol)
    # f32 compute checks exact semantics tightly; bf16 is the fast MXU path
    # (looser tolerance accounts only for bf16 input rounding).
    configs = [
        (k_a, 2, 4, 8, 16, 16, 2, jnp.float32, 1e-3),
        (k_a, 2, 4, 8, 16, 16, 2, jnp.bfloat16, 5e-2),
        (k_b, 2, 8, 8, 8, 8, 1, jnp.bfloat16, 5e-2),
    ]

    for (k, N, ci, co, H, W, stride, cdt, tol) in configs:
        kx, kp = jax.random.split(k)
        x = jax.random.normal(kx, (N, ci, H, W), jnp.float32)
        params = _make_params(kp, ci, co, stride)

        out = jax.block_until_ready(basic_block_forward(x, params, stride, cdt))
        ref = jax.block_until_ready(ref_basic_block(x, params, stride))

        assert out.shape == ref.shape == (N, co, H // stride, W // stride), \
            f"shape mismatch: {out.shape} vs {ref.shape}"
        assert jnp.allclose(out, ref, atol=tol, rtol=tol), \
            f"mismatch vs JAX reference (stride={stride}, dtype={cdt})"

    print("KERNEL_OK")
</pallas_src>

<mosaic_0001>
module attributes {stable_mosaic.version = 11 : i64} {
  func.func @_conv_stats_kernel(%arg0: i32, %arg1: memref<128x36xf32, #tpu.memory_space<vmem>>, %arg2: memref<36x128xf32, #tpu.memory_space<vmem>>, %arg3: memref<128x128xf32, #tpu.memory_space<vmem>>, %arg4: memref<8x128xf32, #tpu.memory_space<vmem>>) attributes {dimension_semantics = [#tpu.dimension_semantics<parallel>], iteration_bounds = array<i64: 1>, scalar_prefetch = 0 : i64, scratch_operands = 0 : i64, tpu.core_type = #tpu.core_type<tc>, window_params = [{transform_indices = @transform_0, window_bounds = array<i64: 128, 36>}, {pipeline_mode = #tpu.pipeline_mode<synchronous>, transform_indices = @transform_1, window_bounds = array<i64: 36, 128>}, {transform_indices = @transform_2, window_bounds = array<i64: 128, 128>}, {transform_indices = @transform_3, window_bounds = array<i64: 8, 128>}]} {
    %c0 = arith.constant 0 : index
    %c0_0 = arith.constant 0 : index
    %0 = vector.load %arg1[%c0, %c0_0] : memref<128x36xf32, #tpu.memory_space<vmem>>, vector<128x36xf32>
    %c0_1 = arith.constant 0 : index
    %c0_2 = arith.constant 0 : index
    %1 = vector.load %arg2[%c0_1, %c0_2] : memref<36x128xf32, #tpu.memory_space<vmem>>, vector<36x128xf32>
    %cst = arith.constant dense<0.000000e+00> : vector<128x128xf32>
    %2 = tpu.matmul %0, %1, %cst {dimension_numbers = #tpu.dot_dimension_numbers<[1], [0], [0], [1], [0, 0, 1, 1], [], []>} : vector<128x36xf32>, vector<36x128xf32>, vector<128x128xf32> -> vector<128x128xf32>
    %c0_3 = arith.constant 0 : index
    %c0_4 = arith.constant 0 : index
    %3 = vector.load %arg3[%c0_3, %c0_4] : memref<128x128xf32, #tpu.memory_space<vmem>>, vector<128x128xf32>
    tpu.vector_store %arg3[%c0_3, %c0_4], %2 {strides = array<i32>} : memref<128x128xf32, #tpu.memory_space<vmem>>, vector<128x128xf32>,
    %cst_5 = arith.constant dense<0.000000e+00> : vector<128xf32>
    %4 = vector.multi_reduction <add>, %2, %cst_5 [0] : vector<128x128xf32> to vector<128xf32>
    %5 = vector.shape_cast %4 : vector<128xf32> to vector<1x128xf32>
    %6 = arith.mulf %2, %2 : vector<128x128xf32>
    %cst_6 = arith.constant dense<0.000000e+00> : vector<128xf32>
    %7 = vector.multi_reduction <add>, %6, %cst_6 [0] : vector<128x128xf32> to vector<128xf32>
    %8 = vector.shape_cast %7 : vector<128xf32> to vector<1x128xf32>
    %9 = tpu.iota {dimensions = array<i32: 0>} : vector<8x128xi32>
    %c0_i32 = arith.constant 0 : i32
    %10 = vector.broadcast %c0_i32 : i32 to vector<8x128xi32>
    %11 = arith.cmpi eq, %9, %10 : vector<8x128xi32>
    %c1_i32 = arith.constant 1 : i32
    %12 = vector.broadcast %c1_i32 : i32 to vector<8x128xi32>
    %13 = arith.cmpi eq, %9, %12 : vector<8x128xi32>
    %cst_7 = arith.constant 0.000000e+00 : f32
    %14 = vector.shape_cast %8 : vector<1x128xf32> to vector<1x128xf32>
    %15 = vector.broadcast %14 : vector<1x128xf32> to vector<8x128xf32>
    %16 = vector.broadcast %cst_7 : f32 to vector<8x128xf32>
    %17 = arith.select %13, %15, %16 : vector<8x128xi1>, vector<8x128xf32>
    %18 = vector.shape_cast %5 : vector<1x128xf32> to vector<1x128xf32>
    %19 = vector.broadcast %18 : vector<1x128xf32> to vector<8x128xf32>
    %20 = arith.select %11, %19, %17 : vector<8x128xi1>, vector<8x128xf32>
    %c0_8 = arith.constant 0 : index
    %c0_9 = arith.constant 0 : index
    %21 = vector.load %arg4[%c0_8, %c0_9] : memref<8x128xf32, #tpu.memory_space<vmem>>, vector<8x128xf32>
    tpu.vector_store %arg4[%c0_8, %c0_9], %20 {strides = array<i32>} : memref<8x128xf32, #tpu.memory_space<vmem>>, vector<8x128xf32>,
    return
  }
  func.func @transform_0(%arg0: i32) -> (i32, i32) {
    %c0_i32 = arith.constant 0 : i32
    %c0_i32_0 = arith.constant 0 : i32
    return %arg0, %c0_i32 : i32, i32
  }
  func.func @transform_1(%arg0: i32) -> (i32, i32) {
    %c0_i32 = arith.constant 0 : i32
    %c0_i32_0 = arith.constant 0 : i32
    %c0_i32_1 = arith.constant 0 : i32
    return %c0_i32, %c0_i32_0 : i32, i32
  }
  func.func @transform_2(%arg0: i32) -> (i32, i32) {
    %c0_i32 = arith.constant 0 : i32
    %c0_i32_0 = arith.constant 0 : i32
    return %arg0, %c0_i32 : i32, i32
  }
  func.func @transform_3(%arg0: i32) -> (i32, i32) {
    %c0_i32 = arith.constant 0 : i32
    %c0_i32_0 = arith.constant 0 : i32
    return %arg0, %c0_i32 : i32, i32
  }
}

</mosaic_0001>

<bundles_post_ra>
// kernel: tpu_custom_call.1
= control target key start
LH: loop header
LB: loop body
LE: loop exit
PB: predicated region body
PF: predicated region fallthrough
CT: control target
= control target key end

     0   :  { %9 = vsyncpa [#allocation3], 0  ;;  %vm36_vm0 = vcmask 293888   ;;  %vm85_vm1 = vcmask 1043456   ;;  %s628_s0 = inlined_call_operand.vmem [shape: f32[128,36], index: 0, kind: input, shape index: {}]   ;;  %s629_s1 = inlined_call_operand.vmem [shape: f32[36,128], index: 1, kind: input, shape index: {}]   ;;  %s630_s2 = inlined_call_operand.hbm [shape: f32[128,128], index: 2, kind: output, shape index: {0}]   ;;  %s631_s3 = inlined_call_operand.hbm [shape: f32[8,128], index: 3, kind: output, shape index: {1}]  }
   0x1   :  { %v31_v0 = vld [vmem:[%s629_s1] sm:$0xff]  ;;  %v32_v1 = vld [vmem:[%s629_s1 + $0x8] sm:$0xff]  ;;  %v33_v2 = vld [vmem:[%s629_s1 + $0x10] sm:$0xff] }
   0x2   :  { %v417_v3 = vpack.c.bf16 %v32_v1, %v31_v0  ;;  %v34_v4 = vld [vmem:[%s629_s1 + $0x18] sm:$0xff]  ;;  %v15_v5 = vld [vmem:[%s628_s0] sm:$0xff] }
   0x3   :  { %v421_v6 = vpack.c.bf16 %v34_v4, %v33_v2  ;;  %393 = vmatprep.mubr.msk.f32.mxu0 %vm36_vm0, %v15_v5  ;;  %v23_v7 = vld [vmem:[%s628_s0 + $0x40] sm:$0xff] }
   0x4   :  { %418 = vmatprep.subr.bf16.mxu0 %v417_v3  ;;  %425 = vmatprep.subr.bf16.mxu1 %v417_v3  ;;  %v35_v8 = vld [vmem:[%s629_s1 + $0x20] sm:$0xf] }
   0x5   :  { %420 = vmatpush3.bf16.msra.mxu0 %v417_v3  ;;  %428 = vmatpush3.bf16.msra.mxu1 %v417_v3 }
   0x6   :  { %422 = vmatprep.subr.bf16.mxu0 %v421_v6  ;;  %426 = vmatprep.subr.bf16.mxu1 %v421_v6 }
   0x7   :  { %405 = vmatprep.mubr.msk.f32.mxu1 %vm36_vm0, %v23_v7 }
   0x8   :  { %10 = vsyncpa [#allocation5], 0  ;;  %v16_v9 = vld [vmem:[%s628_s0 + $0x8] sm:$0xff]  ;;  %v17_v11 = vld [vmem:[%s628_s0 + $0x10] sm:$0xff] }
   0x9   :  { %424 = vmatpush3.bf16.msra.mxu0 %v421_v6  ;;  %429 = vmatpush3.bf16.msra.mxu1 %v421_v6  ;;  %v24_v10 = vld [vmem:[%s628_s0 + $0x48] sm:$0xff]  ;;  %v25_v12 = vld [vmem:[%s628_s0 + $0x50] sm:$0xff]  ;;  %v18_v13 = vld [vmem:[%s628_s0 + $0x18] sm:$0xff] }
   0xa   :  { %391 = vmatprep.subr.msk.mxu0 %vm85_vm1, %v35_v8  ;;  %427 = vmatprep.subr.msk.mxu1 %vm85_vm1, %v35_v8  ;;  %v26_v14 = vld [vmem:[%s628_s0 + $0x58] sm:$0xff]  ;;  %v19_v15 = vld [vmem:[%s628_s0 + $0x20] sm:$0xff]  ;;  %v20_v17 = vld [vmem:[%s628_s0 + $0x28] sm:$0xff] }
   0xb   :  { %v27_v16 = vld [vmem:[%s628_s0 + $0x60] sm:$0xff]  ;;  %v28_v18 = vld [vmem:[%s628_s0 + $0x68] sm:$0xff]  ;;  %v21_v19 = vld [vmem:[%s628_s0 + $0x30] sm:$0xff] }
   0xc   :  { %v29_v20 = vld [vmem:[%s628_s0 + $0x70] sm:$0xff]  ;;  %v22_v21 = vld [vmem:[%s628_s0 + $0x38] sm:$0xff] }
   0xd   :  { %392 = vmatpush3.msk.msra.mxu0 %vm85_vm1, %v35_v8  ;;  %430 = vmatpush3.msk.msra.mxu1 %vm85_vm1, %v35_v8  ;;  %v30_v22 = vld [vmem:[%s628_s0 + $0x78] sm:$0xff]  ;;  %s483_s0 = smov [#allocation2]  }
   0xe   :  { %394 = vmatmul.mubr.msk.f32.vlgmr.msra.gmra.mrb[0].mxu0 %vm36_vm0, %v16_v9  ;;  %406 = vmatmul.mubr.msk.f32.vlgmr.msra.gmra.mrb[0].mxu1 %vm36_vm0, %v24_v10  ;;  %s320_s26 = sshll.u32 %s483_s0, 4  ;;  %s321_s26 = int_to_ptr.vmem [resolvable:$true] %s320_s26 }
   0xf   :  { %396 = vmatprep.mubr.msk.f32.mxu0 %vm36_vm0, %v17_v11  ;;  %408 = vmatprep.mubr.msk.f32.mxu1 %vm36_vm0, %v25_v12  ;;  %s435_s27 = scalar_lea.vmem %s321_s26, 2048  ;;  %p440_p1 = scmp.lt.s32.totalorder %s321_s26, %s321_s26 }
  0x10   :  { %p436_p0 = scmp.ne.s32.totalorder %s321_s26, %s435_s27  ;;  %p441_p2 = scmp.lt.s32.totalorder %s435_s27, %s435_s27 }
  0x12   :  { %397 = vmatmul.mubr.msk.f32.gmra.mrb[2].mxu0 %vm36_vm0, %v18_v13  ;;  %409 = vmatmul.mubr.msk.f32.gmra.mrb[2].mxu1 %vm36_vm0, %v26_v14  ;;  %p442_p3 = por %p441_p2, %p440_p1 }
  0x13   :  { %399 = vmatprep.mubr.msk.f32.mxu0 %vm36_vm0, %v19_v15  ;;  %411 = vmatprep.mubr.msk.f32.mxu1 %vm36_vm0, %v27_v16 }
  0x14   :  { %p443_p4 = pnand %p442_p3, %p436_p0 }
  0x16   :  { %400 = vmatmul.mubr.msk.f32.gmra.mrb[4].mxu0 %vm36_vm0, %v20_v17  ;;  %412 = vmatmul.mubr.msk.f32.gmra.mrb[4].mxu1 %vm36_vm0, %v28_v18 }
  0x17   :  { %402 = vmatprep.mubr.msk.f32.mxu0 %vm36_vm0, %v21_v19  ;;  %414 = vmatprep.mubr.msk.f32.mxu1 %vm36_vm0, %v29_v20 }
  0x1a   :  { %403 = vmatmul.mubr.msk.f32.gmra.mrb[6].mxu0 %vm36_vm0, %v22_v21  ;;  %415 = vmatmul.mubr.msk.f32.gmra.mrb[6].mxu1 %vm36_vm0, %v30_v22 }
  0xe1   :  { %v395_v23 = vpop.f32.mrb[0].mxu0  ;;  %v586_v24 = vpop.f32.mrb[0].mxu1 }
  0xe2   :  { %235 = vst [vmem:[#allocation2 + $0x8] sm:$0xff] %v395_v23  ;;  %v272_v25 = vmul.f32 %v395_v23, %v395_v23  ;;  %v155_v26 = vpop.f32.mrb[1].mxu0  ;;  %243 = vst [vmem:[#allocation2 + $0x48] sm:$0xff] %v586_v24  ;;  %v589_v27 = vpop.f32.mrb[1].mxu1 }
  0xe3   :  { %234 = vst [vmem:[#allocation2] sm:$0xff] %v155_v26  ;;  %v250_v28 = vadd.f32 %v395_v23, %v155_v26  ;;  %v271_v29 = vmul.f32 %v155_v26, %v155_v26  ;;  %242 = vst [vmem:[#allocation2 + $0x40] sm:$0xff] %v589_v27 }
  0xe5   :  { %v287_v30 = vadd.f32 %v272_v25, %v271_v29  ;;  %v398_v31 = vpop.f32.mrb[2].mxu0  ;;  %v592_v32 = vpop.f32.mrb[2].mxu1 }
  0xe6   :  { %237 = vst [vmem:[#allocation2 + $0x18] sm:$0xff] %v398_v31  ;;  %v165_v33 = vpop.f32.mrb[3].mxu0  ;;  %245 = vst [vmem:[#allocation2 + $0x58] sm:$0xff] %v592_v32  ;;  %v205_v34 = vpop.f32.mrb[3].mxu1  ;;  %v274_v37 = vmul.f32 %v398_v31, %v398_v31 }
  0xe7   :  { %236 = vst [vmem:[#allocation2 + $0x10] sm:$0xff] %v165_v33  ;;  %v251_v35 = vadd.f32 %v250_v28, %v165_v33  ;;  %v273_v36 = vmul.f32 %v165_v33, %v165_v33  ;;  %244 = vst [vmem:[#allocation2 + $0x50] sm:$0xff] %v205_v34 }
  0xe9   :  { %v288_v38 = vadd.f32 %v287_v30, %v273_v36  ;;  %v401_v39 = vpop.f32.mrb[4].mxu0  ;;  %v252_v40 = vadd.f32 %v398_v31, %v251_v35  ;;  %v413_v41 = vpop.f32.mrb[4].mxu1 }
  0xea   :  { %239 = vst [vmem:[#allocation2 + $0x28] sm:$0xff] %v401_v39  ;;  %v175_v42 = vpop.f32.mrb[5].mxu0  ;;  %247 = vst [vmem:[#allocation2 + $0x68] sm:$0xff] %v413_v41  ;;  %v215_v43 = vpop.f32.mrb[5].mxu1  ;;  %v276_v47 = vmul.f32 %v401_v39, %v401_v39 }
  0xeb   :  { %238 = vst [vmem:[#allocation2 + $0x20] sm:$0xff] %v175_v42  ;;  %v253_v44 = vadd.f32 %v252_v40, %v175_v42  ;;  %v275_v45 = vmul.f32 %v175_v42, %v175_v42  ;;  %v289_v46 = vadd.f32 %v288_v38, %v274_v37  ;;  %246 = vst [vmem:[#allocation2 + $0x60] sm:$0xff] %v215_v43 }
  0xed   :  { %v290_v48 = vadd.f32 %v289_v46, %v275_v45  ;;  %v404_v49 = vpop.f32.mrb[6].mxu0  ;;  %v254_v50 = vadd.f32 %v401_v39, %v253_v44  ;;  %v416_v51 = vpop.f32.mrb[6].mxu1 }
  0xee   :  { %241 = vst [vmem:[#allocation2 + $0x38] sm:$0xff] %v404_v49  ;;  %v185_v52 = vpop.f32.mrb[7].mxu0  ;;  %249 = vst [vmem:[#allocation2 + $0x78] sm:$0xff] %v416_v51  ;;  %v225_v53 = vpop.f32.mrb[7].mxu1 }
  0xef   :  { %240 = vst [vmem:[#allocation2 + $0x30] sm:$0xff] %v185_v52  ;;  %v255_v54 = vadd.f32 %v254_v50, %v185_v52  ;;  %v277_v55 = vmul.f32 %v185_v52, %v185_v52  ;;  %v291_v56 = vadd.f32 %v290_v48, %v276_v47  ;;  %248 = vst [vmem:[#allocation2 + $0x70] sm:$0xff] %v225_v53 }
  0xf0   :  { %446 = shalt.err (!%p443_p4)
}
  0xf1   :  { %s447_s30 = scalar_lea.hbm %s630_s2, 2048 }
  0xf2   :  { %p448_p5 = scmp.ne.s32.totalorder %s630_s2, %s447_s30  ;;  %p451_p6 = scmp.lt.u32.totalorder %s447_s30, %s630_s2 }
  0xf4   :  { %p453_p7 = pnand %p451_p6, %p448_p5 }
  0xf6   :  { %456 = shalt.err (!%p453_p7)
}
  0xf7   :  { %s484_s7 = smov 128   ;;  %s485_s8 = smov 8   ;;  %v278_v57 = vmul.f32 %v404_v49, %v404_v49  ;;  %v256_v58 = vadd.f32 %v404_v49, %v255_v54  ;;  %v292_v59 = vadd.f32 %v291_v56, %v277_v55  ;;  %v279_v60 = vmul.f32 %v589_v27, %v589_v27 }
  0xf8   :  { %326 = dma.vmem_to_hbm [thread:$0]  %s321_s26, 2048, %s630_s2, [#allocation3], %s484_s7, %s484_s7, %s485_s8   ;;  %v280_v63 = vmul.f32 %v586_v24, %v586_v24  ;;  %v281_v2 = vmul.f32 %v205_v34, %v205_v34  ;;  %v282_v5 = vmul.f32 %v592_v32, %v592_v32  ;;  %v283_v8 = vmul.f32 %v215_v43, %v215_v43 }
  0xf9   :  { %v293_v61 = vadd.f32 %v292_v59, %v278_v57  ;;  %v257_v62 = vadd.f32 %v256_v58, %v589_v27  ;;  %v284_v11 = vmul.f32 %v413_v41, %v413_v41  ;;  %v285_v14 = vmul.f32 %v225_v53, %v225_v53  ;;  %s486_s2 = smov [#allocation4]  }
  0xfa   :  { %v286_v17 = vmul.f32 %v416_v51, %v416_v51  ;;  %s333_s11 = sshll.u32 %s486_s2, 4  ;;  %s334_s11 = int_to_ptr.vmem [resolvable:$true] %s333_s11 }
  0xfb   :  { %v294_v0 = vadd.f32 %v293_v61, %v279_v60  ;;  %v258_v1 = vadd.f32 %v586_v24, %v257_v62  ;;  %v308_v24 = vlaneseq  ;;  %s457_s12 = scalar_lea.vmem %s334_s11, 128  ;;  %p462_p9 = scmp.lt.s32.totalorder %s334_s11, %s334_s11 }
  0xfc   :  { %p458_p8 = scmp.ne.s32.totalorder %s334_s11, %s457_s12  ;;  %p463_p10 = scmp.lt.s32.totalorder %s457_s12, %s457_s12 }
  0xfd   :  { %v259_v3 = vadd.f32 %v258_v1, %v205_v34  ;;  %v295_v4 = vadd.f32 %v294_v0, %v280_v63  ;;  %v309_v29 = vshrl.u32 %v308_v24, 7 }
  0xfe   :  { %p464_p11 = por %p463_p10, %p462_p9 }
  0xff   :  { %v296_v6 = vadd.f32 %v295_v4, %v281_v2  ;;  %v260_v7 = vadd.f32 %v592_v32, %v259_v3  ;;  %vm311_vm2 = vcmp.eq.s32.totalorder %v309_v29, 1  ;;  %vm310_vm3 = vcmp.eq.s32.totalorder %v309_v29, 0 }
 0x100   :  { %p465_p12 = pnand %p464_p11, %p458_p8 }
 0x101   :  { %v261_v9 = vadd.f32 %v260_v7, %v215_v43  ;;  %v297_v10 = vadd.f32 %v296_v6, %v282_v5 }
 0x103   :  { %v298_v12 = vadd.f32 %v297_v10, %v283_v8  ;;  %v262_v13 = vadd.f32 %v413_v41, %v261_v9 }
 0x105   :  { %v263_v15 = vadd.f32 %v262_v13, %v225_v53  ;;  %v299_v16 = vadd.f32 %v298_v12, %v284_v11 }
 0x107   :  { %v264_v18 = vadd.f32 %v416_v51, %v263_v15  ;;  %v300_v19 = vadd.f32 %v299_v16, %v285_v14 }
 0x109   :  { %v265_v20 = vrot.slane %v264_v18, 4  ;;  %v301_v21 = vadd.f32 %v300_v19, %v286_v17 }
 0x10b   :  { %v266_v22 = vadd.f32 %v265_v20, %v264_v18  ;;  %v302_v23 = vrot.slane %v301_v21, 4 }
 0x10d   :  { %v267_v25 = vrot.slane %v266_v22, 2  ;;  %v303_v26 = vadd.f32 %v302_v23, %v301_v21 }
 0x10f   :  { %v268_v27 = vadd.f32 %v267_v25, %v266_v22  ;;  %v304_v28 = vrot.slane %v303_v26, 2 }
 0x111   :  { %v305_v30 = vadd.f32 %v304_v28, %v303_v26  ;;  %v269_v31 = vrot.slane %v268_v27, 1 }
 0x113   :  { %v306_v32 = vrot.slane %v305_v30, 1  ;;  %v270_v34 = vadd.f32 %v269_v31, %v268_v27 }
 0x115   :  { %v307_v33 = vadd.f32 %v306_v32, %v305_v30 }
 0x117   :  { %v312_v35 = vsel %vm311_vm2, %v307_v33, 0.0 }
 0x118   :  { %v313_v36 = vsel %vm310_vm3, %v270_v34, %v312_v35 }
 0x119   :  { %314 = vst [vmem:[#allocation4] sm:$0xff] %v313_v36 }
 0x11a   :  { %468 = shalt.err (!%p465_p12)
}
 0x11b   :  { %s469_s15 = scalar_lea.hbm %s631_s3, 128 }
 0x11c   :  { %p470_p13 = scmp.ne.s32.totalorder %s631_s3, %s469_s15  ;;  %p473_p0 = scmp.lt.u32.totalorder %s469_s15, %s631_s3 }
 0x11e   :  { %p475_p1 = pnand %p473_p0, %p470_p13 }
 0x120   :  { %478 = shalt.err (!%p475_p1)
}
 0x121   :  { %336 = dma.vmem_to_hbm [thread:$0]  %s334_s11, 128, %s631_s3, [#allocation5]  }
 0x122   :  { %479 = dma.done.wait [#allocation3], 2048  }
 0x123   :  { %480 = vsyncadd [#allocation3], 4294965248 }
 0x124   :  { %481 = dma.done.wait [#allocation5], 128  }
 0x125   :  { %482 = vsyncadd [#allocation5], 4294967168 }
 0x126   :  { %343 = vsyncpa [#allocation3], 1 }
 0x127   :  { %344 = vsyncpa [#allocation5], 1 }

</bundles_post_ra>
